<compile_context>
chip_gen: v5e
topology: v5e:2x2
jax: 0.10.0
libtpu: 0.0.40
codegen_flags: <defaults>
</compile_context>

<pallas_src>
import functools

import jax
import jax.numpy as jnp
from jax.experimental import pallas as pl
from jax.experimental.pallas import tpu as pltpu


def _build_copy_plan(chans, half):
    """Static plan of channel-range copies: (src_idx, src_lo, src_hi, dst_lo)."""
    C = sum(chans)
    tail = min(half, C)                  # torch slicing clamps: v3 has min(W//2, C) chans
    plan = []
    dst = 0
    for i, c in enumerate(chans):        # v1 = cat([x1, x2, x3], dim=1)
        if c > 0:
            plan.append((i, 0, c, dst))
        dst += c
    remaining = tail                     # v4 = cat([v1, v1[:, :tail]], dim=1)
    dst = C
    for i, c in enumerate(chans):
        if remaining <= 0:
            break
        take = min(remaining, c)
        if take > 0:
            plan.append((i, 0, take, dst))
        dst += take
        remaining -= take
    return plan, C + tail


def _concat_kernel(x1_ref, x2_ref, x3_ref, out_ref, *, copy_plan):
    # Refs are (channels, rows, lanes): channel is a leading, untiled dim, so
    # every slice below moves whole (rows, lanes) planes -> unmasked full vst,
    # no sublane shuffles, no read-after-write on the output block.
    srcs = (x1_ref, x2_ref, x3_ref)
    for src_idx, lo, hi, dst_lo in copy_plan:
        out_ref[dst_lo:dst_lo + (hi - lo), :, :] = srcs[src_idx][lo:hi, :, :]


def _pick_tile(total_units, bytes_per_unit, budget_bytes):
    """Largest per-step tile (in 128-lane columns / sublane rows) whose
    double-buffered footprint fits the VMEM budget.  Tiny problems run in a
    single step; multi-step grids get an even step count so v7x's two
    TensorCores stay balanced (no-op on v5e/v6e)."""
    max_units = max(8, int(budget_bytes // max(bytes_per_unit, 1)))
    if total_units <= max_units:
        return total_units, 1
    steps = -(-total_units // max_units)
    if steps % 2:
        steps += 1
    tile = -(-total_units // steps)
    tile = -(-tile // 8) * 8             # keep the (8,128) block constraint
    return tile, -(-total_units // tile)


def model_forward(x1, x2, x3):
    N, c1, H, W = x1.shape
    assert x2.shape[0] == N and tuple(x2.shape[2:]) == (H, W), "x2 must match N,H,W"
    assert x3.shape[0] == N and tuple(x3.shape[2:]) == (H, W), "x3 must match N,H,W"
    c2, c3 = x2.shape[1], x3.shape[1]
    chans = (c1, c2, c3)
    dtype = x1.dtype
    itemsize = jnp.dtype(dtype).itemsize

    half = W // 2
    plan, C_out = _build_copy_plan(chans, half)
    L = H * W

    # Bytes per 128-lane column across all inputs + output, double-buffered.
    col_bytes = (sum(chans) + C_out) * 128 * itemsize * 2
    vmem_budget = 8 * 1024 * 1024

    if L % 128 == 0:
        # Aligned path: (N, C, L//128, 128); tile the sublane-row axis.
        S = L // 128
        tile, n_t = _pick_tile(S, col_bytes, vmem_budget)
        in_shape = lambda c: (N, c, S, 128)
        in_block = lambda c: (None, c, tile, 128)
        out_arr = (N, C_out, S, 128)
        out_block = (None, C_out, tile, 128)
        index_map = lambda n, t: (n, 0, t, 0)
    else:
        # Ragged spatial size: lane axis = L, tiled in 128-lane columns
        # (Pallas masks the ragged last block).
        n_cols = -(-L // 128)
        cols, n_t = _pick_tile(n_cols, col_bytes, vmem_budget)
        lt = L if n_t == 1 else cols * 128
        in_shape = lambda c: (N, c, 1, L)
        in_block = lambda c: (None, c, 1, lt)
        out_arr = (N, C_out, 1, L)
        out_block = (None, C_out, 1, lt)
        index_map = lambda n, t: (n, 0, 0, t)

    bytes_in = (x1.size + x2.size + x3.size) * itemsize
    bytes_out = N * C_out * L * itemsize

    out = pl.pallas_call(
        functools.partial(_concat_kernel, copy_plan=plan),
        out_shape=jax.ShapeDtypeStruct(out_arr, dtype),
        grid=(N, n_t),
        in_specs=[
            pl.BlockSpec(in_block(c1), index_map),
            pl.BlockSpec(in_block(c2), index_map),
            pl.BlockSpec(in_block(c3), index_map),
        ],
        out_specs=pl.BlockSpec(out_block, index_map),
        compiler_params=pltpu.CompilerParams(
            dimension_semantics=("parallel", "parallel"),
            vmem_limit_bytes=32 * 1024 * 1024,
        ),
        cost_estimate=pl.CostEstimate(
            flops=0, transcendentals=0,
            bytes_accessed=bytes_in + bytes_out),
    )(x1.reshape(in_shape(c1)),
      x2.reshape(in_shape(c2)),
      x3.reshape(in_shape(c3)))

    return out.reshape(N, C_out, H, W)


def model_forward_ref(x1, x2, x3):
    # Pure-JAX reference mirroring the PyTorch forward (slicing clamps).
    v1 = jnp.concatenate([x1, x2, x3], axis=1)
    v2 = v1[:, 0:9223372036854775807]
    v3 = v2[:, 0:v1.shape[3] // 2]
    return jnp.concatenate([v1, v3], axis=1)


if __name__ == "__main__":
    key = jax.random.PRNGKey(0)
    k1, k2, k3 = jax.random.split(key, 3)

    # Shapes from the original module, with x3's width fixed to 32 so the
    # channel concat is well-formed.  C = 35, W//2 = 16 -> output 51 channels;
    # L = 64*32 = 2048 -> aligned (S=16, 128) path, single grid step.
    x1 = jax.random.normal(k1, (1, 3, 64, 32), dtype=jnp.float32)
    x2 = jax.random.normal(k2, (1, 16, 64, 32), dtype=jnp.float32)
    x3 = jax.random.normal(k3, (1, 16, 64, 32), dtype=jnp.float32)

    out = jax.block_until_ready(model_forward(x1, x2, x3))

    ref = model_forward_ref(x1, x2, x3)
    assert out.shape == ref.shape, (out.shape, ref.shape)
    assert jnp.array_equal(out, ref), "mismatch vs pure-JAX reference"

    print("KERNEL_OK")
</pallas_src>

<mosaic_0001>
module attributes {stable_mosaic.version = 11 : i64} {
  func.func @_concat_kernel(%arg0: i32, %arg1: i32, %arg2: memref<1x3x16x128xf32, #tpu.memory_space<vmem>>, %arg3: memref<1x16x16x128xf32, #tpu.memory_space<vmem>>, %arg4: memref<1x16x16x128xf32, #tpu.memory_space<vmem>>, %arg5: memref<1x51x16x128xf32, #tpu.memory_space<vmem>>) attributes {dimension_semantics = [#tpu.dimension_semantics<parallel>, #tpu.dimension_semantics<parallel>], iteration_bounds = array<i64: 1, 1>, scalar_prefetch = 0 : i64, scratch_operands = 0 : i64, tpu.core_type = #tpu.core_type<tc>, window_params = [{transform_indices = @transform_0, window_bounds = array<i64: 1, 3, 16, 128>}, {transform_indices = @transform_1, window_bounds = array<i64: 1, 16, 16, 128>}, {transform_indices = @transform_2, window_bounds = array<i64: 1, 16, 16, 128>}, {transform_indices = @transform_3, window_bounds = array<i64: 1, 51, 16, 128>}]} {
    %c0 = arith.constant 0 : index
    %c0_0 = arith.constant 0 : index
    %c0_1 = arith.constant 0 : index
    %c0_2 = arith.constant 0 : index
    %0 = vector.load %arg2[%c0, %c0_0, %c0_1, %c0_2] : memref<1x3x16x128xf32, #tpu.memory_space<vmem>>, vector<1x3x16x128xf32>
    %1 = vector.shape_cast %0 : vector<1x3x16x128xf32> to vector<3x16x128xf32>
    %c0_3 = arith.constant 0 : index
    %c0_4 = arith.constant 0 : index
    %c0_5 = arith.constant 0 : index
    %c0_6 = arith.constant 0 : index
    %2 = vector.load %arg5[%c0_3, %c0_4, %c0_5, %c0_6] : memref<1x51x16x128xf32, #tpu.memory_space<vmem>>, vector<1x3x16x128xf32>
    %3 = vector.shape_cast %2 : vector<1x3x16x128xf32> to vector<3x16x128xf32>
    %4 = vector.shape_cast %1 : vector<3x16x128xf32> to vector<1x3x16x128xf32>
    tpu.vector_store %arg5[%c0_3, %c0_4, %c0_5, %c0_6], %4 {strides = array<i32>} : memref<1x51x16x128xf32, #tpu.memory_space<vmem>>, vector<1x3x16x128xf32>,
    %c0_7 = arith.constant 0 : index
    %c0_8 = arith.constant 0 : index
    %c0_9 = arith.constant 0 : index
    %c0_10 = arith.constant 0 : index
    %5 = vector.load %arg3[%c0_7, %c0_8, %c0_9, %c0_10] : memref<1x16x16x128xf32, #tpu.memory_space<vmem>>, vector<1x16x16x128xf32>
    %6 = vector.shape_cast %5 : vector<1x16x16x128xf32> to vector<16x16x128xf32>
    %c0_11 = arith.constant 0 : index
    %c3 = arith.constant 3 : index
    %c0_12 = arith.constant 0 : index
    %c0_13 = arith.constant 0 : index
    %7 = vector.load %arg5[%c0_11, %c3, %c0_12, %c0_13] : memref<1x51x16x128xf32, #tpu.memory_space<vmem>>, vector<1x16x16x128xf32>
    %8 = vector.shape_cast %7 : vector<1x16x16x128xf32> to vector<16x16x128xf32>
    %9 = vector.shape_cast %6 : vector<16x16x128xf32> to vector<1x16x16x128xf32>
    tpu.vector_store %arg5[%c0_11, %c3, %c0_12, %c0_13], %9 {strides = array<i32>} : memref<1x51x16x128xf32, #tpu.memory_space<vmem>>, vector<1x16x16x128xf32>,
    %c0_14 = arith.constant 0 : index
    %c0_15 = arith.constant 0 : index
    %c0_16 = arith.constant 0 : index
    %c0_17 = arith.constant 0 : index
    %10 = vector.load %arg4[%c0_14, %c0_15, %c0_16, %c0_17] : memref<1x16x16x128xf32, #tpu.memory_space<vmem>>, vector<1x16x16x128xf32>
    %11 = vector.shape_cast %10 : vector<1x16x16x128xf32> to vector<16x16x128xf32>
    %c0_18 = arith.constant 0 : index
    %c19 = arith.constant 19 : index
    %c0_19 = arith.constant 0 : index
    %c0_20 = arith.constant 0 : index
    %12 = vector.load %arg5[%c0_18, %c19, %c0_19, %c0_20] : memref<1x51x16x128xf32, #tpu.memory_space<vmem>>, vector<1x16x16x128xf32>
    %13 = vector.shape_cast %12 : vector<1x16x16x128xf32> to vector<16x16x128xf32>
    %14 = vector.shape_cast %11 : vector<16x16x128xf32> to vector<1x16x16x128xf32>
    tpu.vector_store %arg5[%c0_18, %c19, %c0_19, %c0_20], %14 {strides = array<i32>} : memref<1x51x16x128xf32, #tpu.memory_space<vmem>>, vector<1x16x16x128xf32>,
    %c0_21 = arith.constant 0 : index
    %c0_22 = arith.constant 0 : index
    %c0_23 = arith.constant 0 : index
    %c0_24 = arith.constant 0 : index
    %15 = vector.load %arg2[%c0_21, %c0_22, %c0_23, %c0_24] : memref<1x3x16x128xf32, #tpu.memory_space<vmem>>, vector<1x3x16x128xf32>
    %16 = vector.shape_cast %15 : vector<1x3x16x128xf32> to vector<3x16x128xf32>
    %c0_25 = arith.constant 0 : index
    %c35 = arith.constant 35 : index
    %c0_26 = arith.constant 0 : index
    %c0_27 = arith.constant 0 : index
    %17 = vector.load %arg5[%c0_25, %c35, %c0_26, %c0_27] : memref<1x51x16x128xf32, #tpu.memory_space<vmem>>, vector<1x3x16x128xf32>
    %18 = vector.shape_cast %17 : vector<1x3x16x128xf32> to vector<3x16x128xf32>
    %19 = vector.shape_cast %16 : vector<3x16x128xf32> to vector<1x3x16x128xf32>
    tpu.vector_store %arg5[%c0_25, %c35, %c0_26, %c0_27], %19 {strides = array<i32>} : memref<1x51x16x128xf32, #tpu.memory_space<vmem>>, vector<1x3x16x128xf32>,
    %c0_28 = arith.constant 0 : index
    %c0_29 = arith.constant 0 : index
    %c0_30 = arith.constant 0 : index
    %c0_31 = arith.constant 0 : index
    %20 = vector.load %arg3[%c0_28, %c0_29, %c0_30, %c0_31] : memref<1x16x16x128xf32, #tpu.memory_space<vmem>>, vector<1x13x16x128xf32>
    %21 = vector.shape_cast %20 : vector<1x13x16x128xf32> to vector<13x16x128xf32>
    %c0_32 = arith.constant 0 : index
    %c38 = arith.constant 38 : index
    %c0_33 = arith.constant 0 : index
    %c0_34 = arith.constant 0 : index
    %22 = vector.load %arg5[%c0_32, %c38, %c0_33, %c0_34] : memref<1x51x16x128xf32, #tpu.memory_space<vmem>>, vector<1x13x16x128xf32>
    %23 = vector.shape_cast %22 : vector<1x13x16x128xf32> to vector<13x16x128xf32>
    %24 = vector.shape_cast %21 : vector<13x16x128xf32> to vector<1x13x16x128xf32>
    tpu.vector_store %arg5[%c0_32, %c38, %c0_33, %c0_34], %24 {strides = array<i32>} : memref<1x51x16x128xf32, #tpu.memory_space<vmem>>, vector<1x13x16x128xf32>,
    return
  }
  func.func @transform_0(%arg0: i32, %arg1: i32) -> (i32, i32, i32, i32) {
    %c0_i32 = arith.constant 0 : i32
    %c0_i32_0 = arith.constant 0 : i32
    %c0_i32_1 = arith.constant 0 : i32
    return %arg0, %c0_i32, %arg1, %c0_i32_0 : i32, i32, i32, i32
  }
  func.func @transform_1(%arg0: i32, %arg1: i32) -> (i32, i32, i32, i32) {
    %c0_i32 = arith.constant 0 : i32
    %c0_i32_0 = arith.constant 0 : i32
    %c0_i32_1 = arith.constant 0 : i32
    return %arg0, %c0_i32, %arg1, %c0_i32_0 : i32, i32, i32, i32
  }
  func.func @transform_2(%arg0: i32, %arg1: i32) -> (i32, i32, i32, i32) {
    %c0_i32 = arith.constant 0 : i32
    %c0_i32_0 = arith.constant 0 : i32
    %c0_i32_1 = arith.constant 0 : i32
    return %arg0, %c0_i32, %arg1, %c0_i32_0 : i32, i32, i32, i32
  }
  func.func @transform_3(%arg0: i32, %arg1: i32) -> (i32, i32, i32, i32) {
    %c0_i32 = arith.constant 0 : i32
    %c0_i32_0 = arith.constant 0 : i32
    %c0_i32_1 = arith.constant 0 : i32
    return %arg0, %c0_i32, %arg1, %c0_i32_0 : i32, i32, i32, i32
  }
}

</mosaic_0001>

<bundles_post_ra>
// kernel: tpu_custom_call.1
= control target key start
LH: loop header
LB: loop body
LE: loop exit
PB: predicated region body
PF: predicated region fallthrough
CT: control target
= control target key end

     0   :  { %8 = vsyncpa [#allocation3], 0  ;;  %s576_s0 = inlined_call_operand.hbm [shape: f32[1,3,16,128], index: 0, kind: input, shape index: {}]   ;;  %s577_s1 = inlined_call_operand.hbm [shape: f32[1,16,16,128], index: 1, kind: input, shape index: {}]   ;;  %s578_s2 = inlined_call_operand.hbm [shape: f32[1,16,16,128], index: 2, kind: input, shape index: {}]   ;;  %s579_s3 = inlined_call_operand.hbm [shape: f32[1,51,16,128], index: 3, kind: output, shape index: {}]  }
   0x1   :  { %9 = vsyncpa [#allocation6], 0 }
   0x2   :  { %10 = vsyncpa [#allocation4], 0  ;;  %s28_s14 = sshll.u32 %s577_s1, 4  ;;  %s398_s15 = smov [#allocation5]   ;;  %s29_s14 = int_to_ptr.hbm [resolvable:$true] %s28_s14 }
   0x3   :  { %s30_s16 = sshll.u32 %s398_s15, 4  ;;  %s15_s19 = sshll.u32 %s576_s0, 4  ;;  %s31_s16 = int_to_ptr.vmem [resolvable:$true] %s30_s16  ;;  %s16_s19 = int_to_ptr.hbm [resolvable:$true] %s15_s19 }
   0x4   :  { %s399_s20 = smov 128   ;;  %s400_s21 = smov 8  }
   0x5   :  { %36 = dma.hbm_to_vmem [thread:$0]  %s29_s14, 4096, %s31_s16, [#allocation6], %s399_s20, %s399_s20, %s400_s21  }
   0x6   :  { %s401_s22 = smov [#allocation2]   ;;  %s41_s1 = sshll.u32 %s578_s2, 4  ;;  %s42_s1 = int_to_ptr.hbm [resolvable:$true] %s41_s1 }
   0x7   :  { %s17_s23 = sshll.u32 %s401_s22, 4  ;;  %s402_s0 = smov [#allocation7]   ;;  %s18_s23 = int_to_ptr.vmem [resolvable:$true] %s17_s23 }
   0x8   :  { %23 = dma.hbm_to_vmem [thread:$0]  %s16_s19, 768, %s18_s23, [#allocation3], %s399_s20, %s399_s20, %s400_s21  }
   0x9   :  { %s43_s26 = sshll.u32 %s402_s0, 4  ;;  %s44_s26 = int_to_ptr.vmem [resolvable:$true] %s43_s26 }
   0xa   :  { %49 = dma.hbm_to_vmem [thread:$0]  %s42_s1, 4096, %s44_s26, [#allocation6], %s399_s20, %s399_s20, %s400_s21  }
   0xb   :  { %392 = dma.done.wait [#allocation3], 768  }
   0xc   :  { %393 = vsyncadd [#allocation3], 4294966528 }
   0xd   :  { %394 = dma.done.wait [#allocation6], 8192  }
   0xe   :  { %395 = vsyncadd [#allocation6], 4294959104  ;;  %v442_v0 = vld [vmem:[#allocation2] sm:$0xff]  ;;  %v444_v1 = vld [vmem:[#allocation2 + $0x8] sm:$0xff]  ;;  %s403_s2 = smov [#allocation8]   ;;  %s276_s30 = sshll.u32 %s579_s3, 4  ;;  %s277_s30 = int_to_ptr.hbm [resolvable:$true] %s276_s30 }
   0xf   :  { %v446_v2 = vld [vmem:[#allocation2 + $0x10] sm:$0xff]  ;;  %68 = vst [vmem:[#allocation8] sm:$0xff] %v442_v0  ;;  %v449_v3 = vld [vmem:[#allocation2 + $0x18] sm:$0xff]  ;;  %v452_v4 = vld [vmem:[#allocation2 + $0x20] sm:$0xff]  ;;  %s274_s27 = sshll.u32 %s403_s2, 4  ;;  %s275_s27 = int_to_ptr.vmem [resolvable:$true] %s274_s27 }
  0x10   :  { %69 = vst [vmem:[#allocation8 + $0x8] sm:$0xff] %v444_v1  ;;  %v455_v5 = vld [vmem:[#allocation2 + $0x28] sm:$0xff]  ;;  %v458_v6 = vld [vmem:[#allocation5] sm:$0xff]  ;;  %v461_v7 = vld [vmem:[#allocation5 + $0x8] sm:$0xff] }
  0x11   :  { %70 = vst [vmem:[#allocation8 + $0x10] sm:$0xff] %v446_v2  ;;  %v464_v8 = vld [vmem:[#allocation5 + $0x10] sm:$0xff]  ;;  %v467_v9 = vld [vmem:[#allocation5 + $0x18] sm:$0xff]  ;;  %v470_v10 = vld [vmem:[#allocation5 + $0x20] sm:$0xff] }
  0x12   :  { %71 = vst [vmem:[#allocation8 + $0x18] sm:$0xff] %v449_v3  ;;  %v473_v11 = vld [vmem:[#allocation5 + $0x28] sm:$0xff]  ;;  %v476_v12 = vld [vmem:[#allocation5 + $0x30] sm:$0xff]  ;;  %v479_v13 = vld [vmem:[#allocation5 + $0x38] sm:$0xff] }
  0x13   :  { %72 = vst [vmem:[#allocation8 + $0x20] sm:$0xff] %v452_v4  ;;  %v482_v14 = vld [vmem:[#allocation5 + $0x40] sm:$0xff]  ;;  %v485_v15 = vld [vmem:[#allocation5 + $0x48] sm:$0xff]  ;;  %v488_v16 = vld [vmem:[#allocation5 + $0x50] sm:$0xff] }
  0x14   :  { %73 = vst [vmem:[#allocation8 + $0x28] sm:$0xff] %v455_v5  ;;  %v491_v17 = vld [vmem:[#allocation5 + $0x58] sm:$0xff]  ;;  %v494_v18 = vld [vmem:[#allocation5 + $0x60] sm:$0xff]  ;;  %v497_v19 = vld [vmem:[#allocation5 + $0x68] sm:$0xff] }
  0x15   :  { %107 = vst [vmem:[#allocation8 + $0x30] sm:$0xff] %v458_v6  ;;  %v500_v20 = vld [vmem:[#allocation5 + $0x70] sm:$0xff]  ;;  %v503_v21 = vld [vmem:[#allocation5 + $0x78] sm:$0xff]  ;;  %v506_v22 = vld [vmem:[#allocation5 + $0x80] sm:$0xff] }
  0x16   :  { %108 = vst [vmem:[#allocation8 + $0x38] sm:$0xff] %v461_v7  ;;  %v509_v23 = vld [vmem:[#allocation5 + $0x88] sm:$0xff]  ;;  %v512_v24 = vld [vmem:[#allocation5 + $0x90] sm:$0xff]  ;;  %v515_v25 = vld [vmem:[#allocation5 + $0x98] sm:$0xff] }
  0x17   :  { %109 = vst [vmem:[#allocation8 + $0x40] sm:$0xff] %v464_v8  ;;  %v518_v26 = vld [vmem:[#allocation5 + $0xa0] sm:$0xff]  ;;  %v521_v27 = vld [vmem:[#allocation5 + $0xa8] sm:$0xff]  ;;  %v524_v28 = vld [vmem:[#allocation5 + $0xb0] sm:$0xff] }
  0x18   :  { %110 = vst [vmem:[#allocation8 + $0x48] sm:$0xff] %v467_v9  ;;  %v527_v29 = vld [vmem:[#allocation5 + $0xb8] sm:$0xff]  ;;  %v530_v30 = vld [vmem:[#allocation5 + $0xc0] sm:$0xff]  ;;  %v533_v31 = vld [vmem:[#allocation5 + $0xc8] sm:$0xff] }
  0x19   :  { %111 = vst [vmem:[#allocation8 + $0x50] sm:$0xff] %v470_v10  ;;  %v100_v32 = vld [vmem:[#allocation5 + $0xd0] sm:$0xff]  ;;  %v101_v33 = vld [vmem:[#allocation5 + $0xd8] sm:$0xff]  ;;  %v102_v34 = vld [vmem:[#allocation5 + $0xe0] sm:$0xff] }
  0x1a   :  { %112 = vst [vmem:[#allocation8 + $0x58] sm:$0xff] %v473_v11  ;;  %v103_v35 = vld [vmem:[#allocation5 + $0xe8] sm:$0xff]  ;;  %v104_v36 = vld [vmem:[#allocation5 + $0xf0] sm:$0xff]  ;;  %v105_v37 = vld [vmem:[#allocation5 + $0xf8] sm:$0xff] }
  0x1b   :  { %113 = vst [vmem:[#allocation8 + $0x60] sm:$0xff] %v476_v12  ;;  %v139_v38 = vld [vmem:[#allocation7] sm:$0xff]  ;;  %v140_v39 = vld [vmem:[#allocation7 + $0x8] sm:$0xff]  ;;  %v141_v40 = vld [vmem:[#allocation7 + $0x10] sm:$0xff] }
  0x1c   :  { %114 = vst [vmem:[#allocation8 + $0x68] sm:$0xff] %v479_v13  ;;  %v142_v41 = vld [vmem:[#allocation7 + $0x18] sm:$0xff]  ;;  %v143_v42 = vld [vmem:[#allocation7 + $0x20] sm:$0xff]  ;;  %v144_v43 = vld [vmem:[#allocation7 + $0x28] sm:$0xff] }
  0x1d   :  { %115 = vst [vmem:[#allocation8 + $0x70] sm:$0xff] %v482_v14  ;;  %v145_v44 = vld [vmem:[#allocation7 + $0x30] sm:$0xff]  ;;  %v146_v45 = vld [vmem:[#allocation7 + $0x38] sm:$0xff]  ;;  %v147_v46 = vld [vmem:[#allocation7 + $0x40] sm:$0xff] }
  0x1e   :  { %116 = vst [vmem:[#allocation8 + $0x78] sm:$0xff] %v485_v15  ;;  %v148_v47 = vld [vmem:[#allocation7 + $0x48] sm:$0xff]  ;;  %v149_v48 = vld [vmem:[#allocation7 + $0x50] sm:$0xff]  ;;  %v150_v49 = vld [vmem:[#allocation7 + $0x58] sm:$0xff] }
  0x1f   :  { %117 = vst [vmem:[#allocation8 + $0x80] sm:$0xff] %v488_v16  ;;  %v151_v50 = vld [vmem:[#allocation7 + $0x60] sm:$0xff]  ;;  %v152_v51 = vld [vmem:[#allocation7 + $0x68] sm:$0xff]  ;;  %v153_v52 = vld [vmem:[#allocation7 + $0x70] sm:$0xff] }
  0x20   :  { %118 = vst [vmem:[#allocation8 + $0x88] sm:$0xff] %v491_v17  ;;  %v154_v53 = vld [vmem:[#allocation7 + $0x78] sm:$0xff]  ;;  %v155_v54 = vld [vmem:[#allocation7 + $0x80] sm:$0xff]  ;;  %v156_v55 = vld [vmem:[#allocation7 + $0x88] sm:$0xff] }
  0x21   :  { %119 = vst [vmem:[#allocation8 + $0x90] sm:$0xff] %v494_v18  ;;  %v157_v56 = vld [vmem:[#allocation7 + $0x90] sm:$0xff]  ;;  %v158_v57 = vld [vmem:[#allocation7 + $0x98] sm:$0xff]  ;;  %v159_v58 = vld [vmem:[#allocation7 + $0xa0] sm:$0xff] }
  0x22   :  { %120 = vst [vmem:[#allocation8 + $0x98] sm:$0xff] %v497_v19  ;;  %v160_v59 = vld [vmem:[#allocation7 + $0xa8] sm:$0xff]  ;;  %v161_v60 = vld [vmem:[#allocation7 + $0xb0] sm:$0xff]  ;;  %v162_v61 = vld [vmem:[#allocation7 + $0xb8] sm:$0xff] }
  0x23   :  { %121 = vst [vmem:[#allocation8 + $0xa0] sm:$0xff] %v500_v20  ;;  %v163_v62 = vld [vmem:[#allocation7 + $0xc0] sm:$0xff]  ;;  %v164_v63 = vld [vmem:[#allocation7 + $0xc8] sm:$0xff] }
  0x24   :  { %122 = vst [vmem:[#allocation8 + $0xa8] sm:$0xff] %v503_v21 }
  0x25   :  { %123 = vst [vmem:[#allocation8 + $0xb0] sm:$0xff] %v506_v22 }
  0x26   :  { %124 = vst [vmem:[#allocation8 + $0xb8] sm:$0xff] %v509_v23 }
  0x27   :  { %125 = vst [vmem:[#allocation8 + $0xc0] sm:$0xff] %v512_v24 }
  0x28   :  { %126 = vst [vmem:[#allocation8 + $0xc8] sm:$0xff] %v515_v25 }
  0x29   :  { %127 = vst [vmem:[#allocation8 + $0xd0] sm:$0xff] %v518_v26 }
  0x2a   :  { %128 = vst [vmem:[#allocation8 + $0xd8] sm:$0xff] %v521_v27 }
  0x2b   :  { %129 = vst [vmem:[#allocation8 + $0xe0] sm:$0xff] %v524_v28 }
  0x2c   :  { %130 = vst [vmem:[#allocation8 + $0xe8] sm:$0xff] %v527_v29 }
  0x2d   :  { %131 = vst [vmem:[#allocation8 + $0xf0] sm:$0xff] %v530_v30 }
  0x2e   :  { %132 = vst [vmem:[#allocation8 + $0xf8] sm:$0xff] %v533_v31 }
  0x2f   :  { %133 = vst [vmem:[#allocation8 + $0x100] sm:$0xff] %v100_v32  ;;  %v165_v32 = vld [vmem:[#allocation7 + $0xd0] sm:$0xff] }
  0x30   :  { %134 = vst [vmem:[#allocation8 + $0x108] sm:$0xff] %v101_v33  ;;  %v166_v33 = vld [vmem:[#allocation7 + $0xd8] sm:$0xff] }
  0x31   :  { %135 = vst [vmem:[#allocation8 + $0x110] sm:$0xff] %v102_v34  ;;  %v167_v34 = vld [vmem:[#allocation7 + $0xe0] sm:$0xff] }
  0x32   :  { %136 = vst [vmem:[#allocation8 + $0x118] sm:$0xff] %v103_v35  ;;  %v168_v35 = vld [vmem:[#allocation7 + $0xe8] sm:$0xff] }
  0x33   :  { %137 = vst [vmem:[#allocation8 + $0x120] sm:$0xff] %v104_v36  ;;  %v169_v36 = vld [vmem:[#allocation7 + $0xf0] sm:$0xff] }
  0x34   :  { %138 = vst [vmem:[#allocation8 + $0x128] sm:$0xff] %v105_v37  ;;  %v170_v37 = vld [vmem:[#allocation7 + $0xf8] sm:$0xff] }
  0x35   :  { %172 = vst [vmem:[#allocation8 + $0x130] sm:$0xff] %v139_v38 }
  0x36   :  { %173 = vst [vmem:[#allocation8 + $0x138] sm:$0xff] %v140_v39 }
  0x37   :  { %174 = vst [vmem:[#allocation8 + $0x140] sm:$0xff] %v141_v40 }
  0x38   :  { %175 = vst [vmem:[#allocation8 + $0x148] sm:$0xff] %v142_v41 }
  0x39   :  { %176 = vst [vmem:[#allocation8 + $0x150] sm:$0xff] %v143_v42 }
  0x3a   :  { %177 = vst [vmem:[#allocation8 + $0x158] sm:$0xff] %v144_v43 }
  0x3b   :  { %178 = vst [vmem:[#allocation8 + $0x160] sm:$0xff] %v145_v44 }
  0x3c   :  { %179 = vst [vmem:[#allocation8 + $0x168] sm:$0xff] %v146_v45 }
  0x3d   :  { %180 = vst [vmem:[#allocation8 + $0x170] sm:$0xff] %v147_v46 }
  0x3e   :  { %181 = vst [vmem:[#allocation8 + $0x178] sm:$0xff] %v148_v47 }
  0x3f   :  { %182 = vst [vmem:[#allocation8 + $0x180] sm:$0xff] %v149_v48 }
  0x40   :  { %183 = vst [vmem:[#allocation8 + $0x188] sm:$0xff] %v150_v49 }
  0x41   :  { %184 = vst [vmem:[#allocation8 + $0x190] sm:$0xff] %v151_v50 }
  0x42   :  { %185 = vst [vmem:[#allocation8 + $0x198] sm:$0xff] %v152_v51 }
  0x43   :  { %186 = vst [vmem:[#allocation8 + $0x1a0] sm:$0xff] %v153_v52 }
  0x44   :  { %187 = vst [vmem:[#allocation8 + $0x1a8] sm:$0xff] %v154_v53 }
  0x45   :  { %188 = vst [vmem:[#allocation8 + $0x1b0] sm:$0xff] %v155_v54 }
  0x46   :  { %189 = vst [vmem:[#allocation8 + $0x1b8] sm:$0xff] %v156_v55 }
  0x47   :  { %190 = vst [vmem:[#allocation8 + $0x1c0] sm:$0xff] %v157_v56 }
  0x48   :  { %191 = vst [vmem:[#allocation8 + $0x1c8] sm:$0xff] %v158_v57 }
  0x49   :  { %192 = vst [vmem:[#allocation8 + $0x1d0] sm:$0xff] %v159_v58 }
  0x4a   :  { %193 = vst [vmem:[#allocation8 + $0x1d8] sm:$0xff] %v160_v59 }
  0x4b   :  { %194 = vst [vmem:[#allocation8 + $0x1e0] sm:$0xff] %v161_v60 }
  0x4c   :  { %195 = vst [vmem:[#allocation8 + $0x1e8] sm:$0xff] %v162_v61 }
  0x4d   :  { %196 = vst [vmem:[#allocation8 + $0x1f0] sm:$0xff] %v163_v62 }
  0x4e   :  { %197 = vst [vmem:[#allocation8 + $0x1f8] sm:$0xff] %v164_v63 }
  0x4f   :  { %198 = vst [vmem:[#allocation8 + $0x200] sm:$0xff] %v165_v32 }
  0x50   :  { %199 = vst [vmem:[#allocation8 + $0x208] sm:$0xff] %v166_v33 }
  0x51   :  { %200 = vst [vmem:[#allocation8 + $0x210] sm:$0xff] %v167_v34 }
  0x52   :  { %201 = vst [vmem:[#allocation8 + $0x218] sm:$0xff] %v168_v35 }
  0x53   :  { %202 = vst [vmem:[#allocation8 + $0x220] sm:$0xff] %v169_v36 }
  0x54   :  { %203 = vst [vmem:[#allocation8 + $0x228] sm:$0xff] %v170_v37 }
  0x55   :  { %211 = vst [vmem:[#allocation8 + $0x230] sm:$0xff] %v442_v0 }
  0x56   :  { %212 = vst [vmem:[#allocation8 + $0x238] sm:$0xff] %v444_v1 }
  0x57   :  { %213 = vst [vmem:[#allocation8 + $0x240] sm:$0xff] %v446_v2 }
  0x58   :  { %214 = vst [vmem:[#allocation8 + $0x248] sm:$0xff] %v449_v3 }
  0x59   :  { %215 = vst [vmem:[#allocation8 + $0x250] sm:$0xff] %v452_v4 }
  0x5a   :  { %216 = vst [vmem:[#allocation8 + $0x258] sm:$0xff] %v455_v5 }
  0x5b   :  { %244 = vst [vmem:[#allocation8 + $0x260] sm:$0xff] %v458_v6 }
  0x5c   :  { %245 = vst [vmem:[#allocation8 + $0x268] sm:$0xff] %v461_v7 }
  0x5d   :  { %246 = vst [vmem:[#allocation8 + $0x270] sm:$0xff] %v464_v8 }
  0x5e   :  { %247 = vst [vmem:[#allocation8 + $0x278] sm:$0xff] %v467_v9 }
  0x5f   :  { %248 = vst [vmem:[#allocation8 + $0x280] sm:$0xff] %v470_v10 }
  0x60   :  { %249 = vst [vmem:[#allocation8 + $0x288] sm:$0xff] %v473_v11 }
  0x61   :  { %250 = vst [vmem:[#allocation8 + $0x290] sm:$0xff] %v476_v12 }
  0x62   :  { %251 = vst [vmem:[#allocation8 + $0x298] sm:$0xff] %v479_v13 }
  0x63   :  { %252 = vst [vmem:[#allocation8 + $0x2a0] sm:$0xff] %v482_v14 }
  0x64   :  { %253 = vst [vmem:[#allocation8 + $0x2a8] sm:$0xff] %v485_v15 }
  0x65   :  { %254 = vst [vmem:[#allocation8 + $0x2b0] sm:$0xff] %v488_v16 }
  0x66   :  { %255 = vst [vmem:[#allocation8 + $0x2b8] sm:$0xff] %v491_v17 }
  0x67   :  { %256 = vst [vmem:[#allocation8 + $0x2c0] sm:$0xff] %v494_v18 }
  0x68   :  { %257 = vst [vmem:[#allocation8 + $0x2c8] sm:$0xff] %v497_v19 }
  0x69   :  { %258 = vst [vmem:[#allocation8 + $0x2d0] sm:$0xff] %v500_v20 }
  0x6a   :  { %259 = vst [vmem:[#allocation8 + $0x2d8] sm:$0xff] %v503_v21 }
  0x6b   :  { %260 = vst [vmem:[#allocation8 + $0x2e0] sm:$0xff] %v506_v22 }
  0x6c   :  { %261 = vst [vmem:[#allocation8 + $0x2e8] sm:$0xff] %v509_v23 }
  0x6d   :  { %262 = vst [vmem:[#allocation8 + $0x2f0] sm:$0xff] %v512_v24 }
  0x6e   :  { %263 = vst [vmem:[#allocation8 + $0x2f8] sm:$0xff] %v515_v25 }
  0x6f   :  { %264 = vst [vmem:[#allocation8 + $0x300] sm:$0xff] %v518_v26 }
  0x70   :  { %265 = vst [vmem:[#allocation8 + $0x308] sm:$0xff] %v521_v27 }
  0x71   :  { %266 = vst [vmem:[#allocation8 + $0x310] sm:$0xff] %v524_v28 }
  0x72   :  { %267 = vst [vmem:[#allocation8 + $0x318] sm:$0xff] %v527_v29 }
  0x73   :  { %268 = vst [vmem:[#allocation8 + $0x320] sm:$0xff] %v530_v30 }
  0x74   :  { %269 = vst [vmem:[#allocation8 + $0x328] sm:$0xff] %v533_v31 }
  0x75   :  { %282 = dma.vmem_to_hbm [thread:$0]  %s275_s27, 13056, %s277_s30, [#allocation4], %s399_s20, %s399_s20, %s400_s21  }
  0x76   :  { %396 = dma.done.wait [#allocation4], 13056  }
  0x77   :  { %397 = vsyncadd [#allocation4], 4294954240 }
  0x78   :  { %287 = vsyncpa [#allocation3], 1 }
  0x79   :  { %288 = vsyncpa [#allocation6], 1 }
  0x7a   :  { %289 = vsyncpa [#allocation4], 1 }

</bundles_post_ra>
